<compile_context>
chip_gen: v5e
topology: v5e:2x2
jax: 0.10.0
libtpu: 0.0.40
codegen_flags: <defaults>
</compile_context>

<pallas_src>
import functools

import jax
import jax.numpy as jnp
from jax.experimental import pallas as pl
from jax.experimental.pallas import tpu as pltpu


# ----------------------------------------------------------------------------
# Tile sizing: pixels-on-lanes tile over H*W.
# ----------------------------------------------------------------------------
def _pick_hw_tile(hw, cin, cout, *, batch=1, min_total_tiles=4,
                  bytes_per_elem=4, budget=10 << 20, target=16384):
    """Pick the pixels-per-tile (lane-axis) size.

    Preference order:
      (a) a multiple of 128 that divides hw exactly (no masked tail),
      (b) fits the double-buffered VMEM budget (in + out, 2 buffers each),
      (c) yields at least `min_total_tiles` total parallel grid steps
          (batch * n_hw_tiles) so both v7x TensorCores get work even at N == 1.
    Falls back to a full-row tile or a masked-tail tile for awkward shapes.
    """
    hw = int(hw)
    if hw < 128:
        return hw                                         # tiny row: full-extent tile

    per_pixel = 2 * (cin + 4 * cout) * bytes_per_elem     # double-buffered in + out
    cap = min(target, max(128, (budget // per_pixel) // 128 * 128))
    min_tiles = max(1, -(-min_total_tiles // max(1, batch)))   # ceil div

    # Largest multiple of 128 that divides hw, fits the cap, gives enough tiles.
    best = 0
    t = 128
    lim = min(cap, hw)
    while t <= lim:
        if hw % t == 0 and hw // t >= min_tiles:
            best = t
        t += 128
    if best:
        return best

    if hw <= cap and min_tiles <= 1:
        return hw                                         # single full-row tile

    # Fallback (hw not nicely divisible): multiple-of-128 tile, masked tail in the
    # stats kernel; dspp's partial last output block store is masked by Pallas.
    return int(min(cap, max(128, (hw // max(1, min_tiles)) // 128 * 128)))


# ----------------------------------------------------------------------------
# Kernel 1: per-channel sum / sum-of-squares (training-mode BN batch statistics).
# x viewed as (N, Cin, HW); grid = (N, HW tiles), both axes parallel.  Each grid
# step writes its own (Cin, 1) partial sums; the tiny (N, T, Cin) reduction is
# done in the wrapper.  No accumulator axis -> full megacore sharding at N == 1.
# ----------------------------------------------------------------------------
def _bn_stats_kernel(x_ref, sum_ref, sq_ref, *, hw_total, hw_tile):
    x = x_ref[...].astype(jnp.float32)                    # (Cin, hw_tile)
    if hw_total % hw_tile != 0:
        # Masked tail tile (general shapes; not exercised when hw_tile divides HW).
        col = (jax.lax.broadcasted_iota(jnp.int32, x.shape, 1)
               + pl.program_id(1) * hw_tile)
        x = jnp.where(col < hw_total, x, 0.0)

    sum_ref[...] = jnp.sum(x, axis=1, keepdims=True)      # (Cin, 1)
    sq_ref[...] = jnp.sum(x * x, axis=1, keepdims=True)


def bn_batch_stats(x3, *, hw_tile):
    """x3: (N, Cin, HW) -> per-(batch, tile) (sum, sum_sq), each (N, T, Cin, 1)."""
    n, cin, hw = x3.shape
    n_tiles = pl.cdiv(hw, hw_tile)
    kern = functools.partial(_bn_stats_kernel, hw_total=hw, hw_tile=hw_tile)
    return pl.pallas_call(
        kern,
        out_shape=(
            jax.ShapeDtypeStruct((n, n_tiles, cin, 1), jnp.float32),
            jax.ShapeDtypeStruct((n, n_tiles, cin, 1), jnp.float32),
        ),
        grid_spec=pltpu.PrefetchScalarGridSpec(
            num_scalar_prefetch=0,
            grid=(n, n_tiles),
            in_specs=[pl.BlockSpec((None, cin, hw_tile), lambda b, t: (b, 0, t))],
            out_specs=(
                pl.BlockSpec((None, None, cin, 1), lambda b, t: (b, t, 0, 0)),
                pl.BlockSpec((None, None, cin, 1), lambda b, t: (b, t, 0, 0)),
            ),
        ),
        compiler_params=pltpu.CompilerParams(
            dimension_semantics=("parallel", "parallel")),
    )(x3)


# ----------------------------------------------------------------------------
# Kernel 2: the whole BN-folded 4-conv pyramid as ONE matmul per tile.
# x block: (Cin, hw_tile)  ->  out block: (4*Cout, hw_tile)  (already NCHW order).
# W_all (4*Cout, Cin) and b_all (4*Cout, 1) are tiny constants resident in VMEM.
# ----------------------------------------------------------------------------
def _dspp_kernel(x_ref, w_ref, b_ref, out_ref):
    x = x_ref[...].astype(jnp.float32)                                  # (Cin, T)
    y = jnp.dot(w_ref[...], x, preferred_element_type=jnp.float32) + b_ref[...]
    out_ref[...] = y.astype(out_ref.dtype)


def dspp_fused(x3, w_all, b_all, *, hw_tile, out_dtype=jnp.float32):
    """x3: (N, Cin, HW); w_all: (4*Cout, Cin) composed+BN-folded; b_all: (4*Cout, 1).
    Returns (N, 4*Cout, HW) in NCHW channel order."""
    n, cin, hw = x3.shape
    c4 = w_all.shape[0]
    grid = (n, pl.cdiv(hw, hw_tile))
    return pl.pallas_call(
        _dspp_kernel,
        out_shape=jax.ShapeDtypeStruct((n, c4, hw), out_dtype),
        grid_spec=pltpu.PrefetchScalarGridSpec(
            num_scalar_prefetch=0,
            grid=grid,
            in_specs=[
                pl.BlockSpec((None, cin, hw_tile), lambda b, t: (b, 0, t)),
                pl.BlockSpec((c4, cin), lambda b, t: (0, 0)),
                pl.BlockSpec((c4, 1), lambda b, t: (0, 0)),
            ],
            out_specs=pl.BlockSpec((None, c4, hw_tile), lambda b, t: (b, 0, t)),
        ),
        compiler_params=pltpu.CompilerParams(
            dimension_semantics=("parallel", "parallel")),
    )(x3, w_all, b_all)


# ----------------------------------------------------------------------------
# Module wrapper: view NCHW as (N, Cin, H*W), compute BN batch stats, fold the
# BN affine into conv1, compose the four convs into one weight/bias, run the
# fused kernel, reshape back.  No transposes anywhere — only free reshapes.
# ----------------------------------------------------------------------------
def dilated_spp_forward(x_nchw, params, *, eps=1e-5, out_dtype=jnp.float32):
    n, cin, h, w = x_nchw.shape
    hw = h * w
    cout = params["w1"].shape[0]
    x3 = x_nchw.reshape(n, cin, hw)                       # pure view, stays NCHW

    hw_tile = _pick_hw_tile(hw, cin, cout, batch=n)

    # --- training-mode BatchNorm2d batch statistics (Pallas kernel 1) ---
    s_nt, sq_nt = bn_batch_stats(x3, hw_tile=hw_tile)     # each (N, T, Cin, 1)
    total = n * hw
    s = jnp.sum(s_nt, axis=(0, 1))[:, 0]                  # (Cin,)
    sq = jnp.sum(sq_nt, axis=(0, 1))[:, 0]                # (Cin,)
    mean = s / total
    # biased variance, clamped to avoid catastrophic-cancellation negatives
    var = jnp.maximum(sq / total - mean * mean, 0.0)
    inv_std = jax.lax.rsqrt(var + eps)
    scale = params["gamma"] * inv_std                     # (Cin,)
    shift = params["beta"] - mean * scale                 # (Cin,)

    # --- fold BN into conv1, then compose all four 1x1 convs into one matmul ---
    #   d1 = Wc1 @ x + bc1,  d_k = Wk @ d_{k-1} + bk  ==>  dk = Wck @ x + bck
    wc1 = params["w1"] * scale[None, :]                   # (Cout, Cin)
    bc1 = params["w1"] @ shift + params["b1"]             # (Cout,)
    wc2 = params["w2"] @ wc1
    bc2 = params["w2"] @ bc1 + params["b2"]
    wc3 = params["w3"] @ wc2
    bc3 = params["w3"] @ bc2 + params["b3"]
    wc4 = params["w4"] @ wc3
    bc4 = params["w4"] @ bc3 + params["b4"]
    w_all = jnp.concatenate([wc1, wc2, wc3, wc4], axis=0)            # (4*Cout, Cin)
    b_all = jnp.concatenate([bc1, bc2, bc3, bc4], axis=0)[:, None]   # (4*Cout, 1)

    out3 = dspp_fused(x3, w_all, b_all, hw_tile=hw_tile,
                      out_dtype=out_dtype)                # (N, 4*Cout, HW)
    return out3.reshape(n, 4 * cout, h, w)                # already NCHW channel order


def make_params(key, in_channels, out_channels):
    ks = jax.random.split(key, 10)
    p = {}
    # BatchNorm2d affine params (deterministic, nontrivial).
    p["gamma"] = 1.0 + 0.1 * jax.random.normal(ks[0], (in_channels,), jnp.float32)
    p["beta"] = 0.1 * jax.random.normal(ks[1], (in_channels,), jnp.float32)
    # 1x1 conv weights stored torch-style as (Cout, Cin) == weight[:, :, 0, 0]
    p["w1"] = 0.2 * jax.random.normal(ks[2], (out_channels, in_channels), jnp.float32)
    p["b1"] = 0.1 * jax.random.normal(ks[3], (out_channels,), jnp.float32)
    p["w2"] = 0.2 * jax.random.normal(ks[4], (out_channels, out_channels), jnp.float32)
    p["b2"] = 0.1 * jax.random.normal(ks[5], (out_channels,), jnp.float32)
    p["w3"] = 0.2 * jax.random.normal(ks[6], (out_channels, out_channels), jnp.float32)
    p["b3"] = 0.1 * jax.random.normal(ks[7], (out_channels,), jnp.float32)
    p["w4"] = 0.2 * jax.random.normal(ks[8], (out_channels, out_channels), jnp.float32)
    p["b4"] = 0.1 * jax.random.normal(ks[9], (out_channels,), jnp.float32)
    return p


def reference_forward(x_nchw, params, eps=1e-5):
    """Pure-JAX reference mirroring the PyTorch forward (training-mode BN)."""
    x = x_nchw.astype(jnp.float32)
    mean = jnp.mean(x, axis=(0, 2, 3), keepdims=True)
    var = jnp.mean((x - mean) ** 2, axis=(0, 2, 3), keepdims=True)
    xb = (x - mean) / jnp.sqrt(var + eps)
    xb = xb * params["gamma"][None, :, None, None] + params["beta"][None, :, None, None]

    def conv1x1(t, w, b):  # t: NCHW, w: (Cout, Cin)
        return jnp.einsum("nchw,oc->nohw", t, w) + b[None, :, None, None]

    d1 = conv1x1(xb, params["w1"], params["b1"])
    d2 = conv1x1(d1, params["w2"], params["b2"])
    d3 = conv1x1(d2, params["w3"], params["b3"])
    d4 = conv1x1(d3, params["w4"], params["b4"])
    return jnp.concatenate([d1, d2, d3, d4], axis=1)


if __name__ == "__main__":
    key = jax.random.PRNGKey(0)
    k_x, k_p = jax.random.split(key)

    N, Cin, H, W = 2, 4, 16, 16
    Cout = 8
    x = jax.random.normal(k_x, (N, Cin, H, W), jnp.float32)
    params = make_params(k_p, Cin, Cout)

    out = dilated_spp_forward(x, params)
    out = jax.block_until_ready(out)

    ref = reference_forward(x, params)
    assert out.shape == (N, 4 * Cout, H, W), out.shape
    max_err = float(jnp.max(jnp.abs(out - ref)))
    assert jnp.allclose(out, ref, atol=2e-4, rtol=2e-4), max_err

    print("KERNEL_OK")
</pallas_src>

<mosaic_0001>
module attributes {stable_mosaic.version = 11 : i64} {
  func.func @_bn_stats_kernel(%arg0: i32, %arg1: i32, %arg2: memref<1x4x128xf32, #tpu.memory_space<vmem>>, %arg3: memref<1x1x4x1xf32, #tpu.memory_space<vmem>>, %arg4: memref<1x1x4x1xf32, #tpu.memory_space<vmem>>) attributes {dimension_semantics = [#tpu.dimension_semantics<parallel>, #tpu.dimension_semantics<parallel>], iteration_bounds = array<i64: 2, 2>, scalar_prefetch = 0 : i64, scratch_operands = 0 : i64, tpu.core_type = #tpu.core_type<tc>, window_params = [{transform_indices = @transform_0, window_bounds = array<i64: 1, 4, 128>}, {transform_indices = @transform_1, window_bounds = array<i64: 1, 1, 4, 1>}, {transform_indices = @transform_2, window_bounds = array<i64: 1, 1, 4, 1>}]} {
    %c0 = arith.constant 0 : index
    %c0_0 = arith.constant 0 : index
    %c0_1 = arith.constant 0 : index
    %0 = vector.load %arg2[%c0, %c0_0, %c0_1] : memref<1x4x128xf32, #tpu.memory_space<vmem>>, vector<1x4x128xf32>
    %1 = vector.shape_cast %0 : vector<1x4x128xf32> to vector<4x128xf32>
    %cst = arith.constant dense<0.000000e+00> : vector<4xf32>
    %2 = vector.multi_reduction <add>, %1, %cst [1] : vector<4x128xf32> to vector<4xf32>
    %3 = vector.shape_cast %2 : vector<4xf32> to vector<4x1xf32>
    %c0_2 = arith.constant 0 : index
    %c0_3 = arith.constant 0 : index
    %c0_4 = arith.constant 0 : index
    %c0_5 = arith.constant 0 : index
    %4 = vector.load %arg3[%c0_2, %c0_3, %c0_4, %c0_5] : memref<1x1x4x1xf32, #tpu.memory_space<vmem>>, vector<1x1x4x1xf32>
    %5 = vector.shape_cast %4 : vector<1x1x4x1xf32> to vector<4x1xf32>
    %6 = vector.shape_cast %3 : vector<4x1xf32> to vector<1x1x4x1xf32>
    tpu.vector_store %arg3[%c0_2, %c0_3, %c0_4, %c0_5], %6 {strides = array<i32>} : memref<1x1x4x1xf32, #tpu.memory_space<vmem>>, vector<1x1x4x1xf32>,
    %7 = arith.mulf %1, %1 : vector<4x128xf32>
    %cst_6 = arith.constant dense<0.000000e+00> : vector<4xf32>
    %8 = vector.multi_reduction <add>, %7, %cst_6 [1] : vector<4x128xf32> to vector<4xf32>
    %9 = vector.shape_cast %8 : vector<4xf32> to vector<4x1xf32>
    %c0_7 = arith.constant 0 : index
    %c0_8 = arith.constant 0 : index
    %c0_9 = arith.constant 0 : index
    %c0_10 = arith.constant 0 : index
    %10 = vector.load %arg4[%c0_7, %c0_8, %c0_9, %c0_10] : memref<1x1x4x1xf32, #tpu.memory_space<vmem>>, vector<1x1x4x1xf32>
    %11 = vector.shape_cast %10 : vector<1x1x4x1xf32> to vector<4x1xf32>
    %12 = vector.shape_cast %9 : vector<4x1xf32> to vector<1x1x4x1xf32>
    tpu.vector_store %arg4[%c0_7, %c0_8, %c0_9, %c0_10], %12 {strides = array<i32>} : memref<1x1x4x1xf32, #tpu.memory_space<vmem>>, vector<1x1x4x1xf32>,
    return
  }
  func.func @transform_0(%arg0: i32, %arg1: i32) -> (i32, i32, i32) {
    %c0_i32 = arith.constant 0 : i32
    %c0_i32_0 = arith.constant 0 : i32
    return %arg0, %c0_i32, %arg1 : i32, i32, i32
  }
  func.func @transform_1(%arg0: i32, %arg1: i32) -> (i32, i32, i32, i32) {
    %c0_i32 = arith.constant 0 : i32
    %c0_i32_0 = arith.constant 0 : i32
    %c0_i32_1 = arith.constant 0 : i32
    return %arg0, %arg1, %c0_i32, %c0_i32_0 : i32, i32, i32, i32
  }
  func.func @transform_2(%arg0: i32, %arg1: i32) -> (i32, i32, i32, i32) {
    %c0_i32 = arith.constant 0 : i32
    %c0_i32_0 = arith.constant 0 : i32
    %c0_i32_1 = arith.constant 0 : i32
    return %arg0, %arg1, %c0_i32, %c0_i32_0 : i32, i32, i32, i32
  }
}

</mosaic_0001>

<bundles_post_ra>
// kernel: tpu_custom_call.1
= control target key start
LH: loop header
LB: loop body
LE: loop exit
PB: predicated region body
PF: predicated region fallthrough
CT: control target
= control target key end

     0   :  { %8 = vsyncpa [#allocation3], 0  ;;  %s678_s0 = inlined_call_operand.hbm [shape: f32[2,4,256], index: 0, kind: input, shape index: {}]   ;;  %s679_s1 = inlined_call_operand.vmem [shape: f32[2,2,4,1], index: 1, kind: output, shape index: {0}]   ;;  %s680_s2 = inlined_call_operand.vmem [shape: f32[2,2,4,1], index: 2, kind: output, shape index: {1}]  }
   0x1   :  { %10 = vsyncpa [#allocation3 + $0x1], 0  ;;  %s560_s9 = smov 0   ;;  %s562_s10 = smov 0  }
   0x2   :  { %s564_s11 = smov 0   ;;  %s566_s12 = smov 0  }
   0x3   :  { %s568_s13 = smov 0   ;;  %s570_s14 = smov 0  }
   0x4   :  { %s572_s15 = smov 0   ;;  %s574_s16 = smov 0  }
   0x5 LB: > { %s361_s17 = sadd.s32 4294967295, %s543_s16   ;;  %s25_s18 = sadd.s32 1, %s535_s14  ;;  %s543_s16 = sphi %s574_s16, %s16_s16   ;;  %s539_s15 = sphi %s572_s15, %s689_s15   ;;  %s535_s14 = sphi %s570_s14, %s688_s14   ;;  %s531_s13 = sphi %s568_s13, %s687_s13   ;;  %s527_s12 = sphi %s566_s12, %s686_s12   ;;  %s523_s11 = sphi %s564_s11, %s685_s11   ;;  %s519_s10 = sphi %s562_s10, %s684_s10   ;;  %s515_s9 = sphi %s560_s9, %s683_s9  }
   0x6   : > { %p26_p0 = scmp.ge.s32.totalorder %s25_s18, 2  ;;  %s28_s19 = sadd.s32 1, %s539_s15 }
   0x7   : > { %s37_s20 = sadd.s32 1, %s523_s11  ;;  %p44_p1 = scmp.ne.s32.totalorder %s523_s11, %s519_s10 }
   0x8   : > { %s691_s18 = smov (%p26_p0, %s25_s18), 0  ;;  %s693_s19 = smov (!%p26_p0, %s28_s19), %s539_s15 }
   0x9   : > { %s33_s21 = ssub.s32 %s535_s14, %s691_s18  ;;  %p45_p2 = scmp.eq.s32.totalorder %s543_s16, 0 }
   0xa   : > { %p30_p3 = scmp.ge.s32.totalorder %s693_s19, 2  ;;  %p50_p4 = scmp.ne.s32.totalorder %s519_s10, %s515_s9 }
   0xb   : > { %p611_p5 = por %p45_p2, %p44_p1  ;;  %p51_p6 = scmp.eq.s32.totalorder %s361_s17, 0 }
   0xc   : > { %s695_s19 = smov (%p30_p3, %s693_s19), 0  ;;  %p382_p8 = scmp.lt.s32.totalorder %s543_s16, 4 }
   0xd   : > { %p617_p7 = por %p51_p6, %p50_p4  ;;  %s32_s24 = ssub.s32 %s539_s15, %s695_s19 }
   0xe   : > { %s34_s25 = sor.u32 %s33_s21, %s32_s24  ;;  %s130_s26 = sand.u32 1, %s523_s11  }
   0xf   : > { %p35_p9 = scmp.eq.s32.totalorder %s34_s25, 0  ;;  %s365_s27 = sshll.u32 %s130_s26, 2 }
  0x10   : > { %s366_s28 = sshll.u32 %s539_s15, 1  ;;  %s134_s4 = scalar_lea.vmem [#allocation2], %s365_s27 }
  0x11   : > { %s627_s29 = scalar_select %p35_p9, %s523_s11, %s37_s20  }
  0x12   : > { %s138_s30 = sadd.s32 %s535_s14, %s366_s28  ;;  %s144_s5 = sshll.u32 %s134_s4, 4  ;;  %s145_s5 = int_to_ptr.vmem [resolvable:$true] %s144_s5 }
  0x13   : > { %s367_s3 = sshll.u32 %s138_s30, 2  ;;  %p379_p10 = pnand %p382_p8, %p611_p5 }
  0x14   : > { %s140_s8 = scalar_lea.hbm %s678_s0, %s367_s3  ;;  %p368_p11 = scmp.ge.s32.totalorder %s543_s16, 1 }
  0x15   : > { %s142_s9 = sshll.u32 %s140_s8, 4  ;;  %p149_p12 = scmp.lt.s32.totalorder %s543_s16, 5  ;;  %s143_s9 = int_to_ptr.hbm [resolvable:$true] %s142_s9 }
  0x16   : > { %s131_s17 = scalar_lea.sflag [#allocation3], %s130_s26 }
  0x17   : > { %381 = dma.hbm_to_vmem [thread:$0]  (!%p379_p10), %s143_s9, 64, %s145_s5, %s131_s17  }
  0x18   : > { %p150_p13 = pnand %p368_p11, %p149_p12 }
  0x19   : > { %s155_s20 = sand.u32 (!%p150_p13), 1, %s519_s10  }
  0x1a   : > { %153 = sbr.rel (%p150_p13) target bundleno = 159 (0x9f), region = 24  ;;  %s369_s21 = sshll.u32 (!%p150_p13), %s155_s20, 2 }
  0x1b   : > { %s156_s24 = scalar_lea.sflag (!%p150_p13), [#allocation3], %s155_s20  ;;  %s159_s25 = scalar_lea.vmem (!%p150_p13), [#allocation2], %s369_s21 }
  0x1f   : > { %510 = dma.done.wait (%p617_p7), %s156_s24, 64  }
  0x20   : > { %512 = vsyncadd (%p617_p7), %s156_s24, 4294967232  ;;  %vm209_vm0 = vcmask 1043456   ;;  %v208_v0 = vld [vmem:[%s159_s25] sm:$0xf]  ;;  %p192_p0 = scmp.lt.s32.totalorder %s531_s13, 1  ;;  %p194_p1 = scmp.lt.s32.totalorder %s527_s12, 1 }
  0x21   : > { %v210_v1 = vsel %vm209_vm0, %v208_v0, 0.0  ;;  %v215_v2 = vmul.f32 %v208_v0, %v208_v0  ;;  %vm213_vm1 = vcmask 3072  }
  0x22   : > { %211 = vadd.xlane.f32.xlu0 %v210_v1  ;;  %s697_s13 = smov (!%p192_p0, %s531_s13), 1  ;;  %s699_s12 = smov (!%p194_p1, %s527_s12), 1 }
  0x23   : > { %v216_v3 = vsel %vm209_vm0, %v215_v2, 0.0  ;;  %s370_s22 = sshll.u32 %s697_s13, 1 }
  0x24   : > { %s197_s26 = sadd.s32 %s370_s22, %s699_s12 }
  0x25   : > { %s371_s27 = sshll.u32 %s197_s26, 2 }
  0x26   : > { %s199_s30 = scalar_lea.vmem %s679_s1, %s371_s27  ;;  %s207_s5 = scalar_lea.vmem %s680_s2, %s371_s27 }
  0x2a   : > { %217 = vadd.xlane.f32.xlu0 %v216_v3 }
  0x95   : > { %v212_v4 = vpop.xlane.xlu0 %211 }
  0x96   : > { %214 = vst.msk [vmem:[%s199_s30] sm:$0xf] %vm213_vm1, %v212_v4 }
  0x9d   : > { %v218_v5 = vpop.xlane.xlu0 %217 }
  0x9e   : > { %219 = vst.msk [vmem:[%s207_s5] sm:$0xf] %vm213_vm1, %v218_v5 }
  0x9f PF: > { %s16_s16 = sadd.s32 1, %s543_s16   ;;  %s683_s9 = smov %s519_s10 }
  0xa0   : > { %p13_p2 = scmp.ge.s32.totalorder %s16_s16, 6   ;;  %s684_s10 = smov %s523_s11 }
  0xa1   : > { %s685_s11 = smov %s627_s29  ;;  %s686_s12 = smov %s535_s14 }
  0xa2   : > { %s687_s13 = smov %s539_s15  ;;  %s688_s14 = smov %s691_s18 }
  0xa3   : > { %s689_s15 = smov %s695_s19  ;;  %15 = sbr.rel (!%p13_p2) target bundleno = 5 (0x5), region = 76 }
  0xa8   :  { %269 = vsyncpa [#allocation3], 1 }
  0xa9   :  { %271 = vsyncpa [#allocation3 + $0x1], 1 }

</bundles_post_ra>
